<compile_context>
chip_gen: v6e
topology: v6e:2x2x1
jax: 0.10.0
libtpu: 0.0.40
codegen_flags: <defaults>
</compile_context>

<pallas_src>
import jax
import jax.numpy as jnp
from jax.experimental import pallas as pl
from jax.experimental.pallas import tpu as pltpu


def _lstm_kernel(x_ref, wih_ref, whh_ref, b_ref, h_out_ref, xproj_ref):
    """Single invocation: full LSTM forward, recurrence unrolled in-kernel.

    x_ref:     (T*B, E)    time-major inputs, flattened over (T, B)
    wih_ref:   (E, 4H)     input->gate weights (pre-transposed; i/f/o cols *0.5)
    whh_ref:   (H, 4H)     hidden->gate weights (pre-transposed; i/f/o cols *0.5)
    b_ref:     (1, 4H)     b_ih + b_hh (i/f/o entries *0.5)
    h_out_ref: (B, H)      final hidden state
    xproj_ref: (T*B, 4H)   VMEM scratch: hoisted input projection
    """
    TB, G = xproj_ref.shape
    B, H = h_out_ref.shape
    T = TB // B

    # Time-parallel projection: one large-M MXU matmul + a single bias add.
    xproj_ref[...] = (
        jnp.dot(x_ref[...], wih_ref[...], preferred_element_type=jnp.float32)
        + b_ref[...]
    )

    # Loop-invariant RHS: read once so it stays resident across the unroll.
    whh = whh_ref[...]

    h = jnp.zeros((B, H), jnp.float32)
    c = jnp.zeros((B, H), jnp.float32)

    # Sequential recurrence, fully unrolled (static T). One (B,H)x(H,4H) MXU
    # matmul + one packed tanh (EUP) + a handful of VPU ops per step.
    for t in range(T):
        gates = xproj_ref[pl.ds(t * B, B), :] + jnp.dot(
            h, whh, preferred_element_type=jnp.float32)        # (B, 4H)
        # i/f/o columns were pre-scaled by 0.5, so a single tanh over the
        # packed gate block gives: sigmoid(z) = 0.5*(tanh(z/2)+1) for i/f/o
        # and tanh(z) for g.
        t_all = jnp.tanh(gates)                                 # (B, 4H)
        i_g = 0.5 * (t_all[:, 0 * H:1 * H] + 1.0)
        f_g = 0.5 * (t_all[:, 1 * H:2 * H] + 1.0)
        g_g = t_all[:, 2 * H:3 * H]
        o_g = 0.5 * (t_all[:, 3 * H:4 * H] + 1.0)
        c = f_g * c + i_g * g_g
        h = o_g * jnp.tanh(c)

    h_out_ref[...] = h.astype(h_out_ref.dtype)


def prepare_encoder_params(w_ih, w_hh, b_ih, b_hh):
    """One-time parameter prep (run OUTSIDE the per-call hot path).

    Converts PyTorch nn.LSTM parameters
        w_ih: (4H, E), w_hh: (4H, H), b_ih/b_hh: (4H,)   gate order (i, f, g, o)
    into the kernel layout
        w_ih_t: (E, 4H), w_hh_t: (H, 4H), bias: (1, 4H)
    with the i/f/o gate columns (and bias entries) pre-scaled by 0.5 so the
    kernel can use the exact identity sigmoid(z) = 0.5*(tanh(z/2) + 1) with a
    single packed tanh per step.
    """
    fourH, _ = w_ih.shape
    H = fourH // 4
    gate_scale = jnp.array([0.5, 0.5, 1.0, 0.5], w_ih.dtype)   # (i, f, g, o)
    col_scale = jnp.repeat(gate_scale, H)                      # (4H,)
    w_ih_t = (w_ih * col_scale[:, None]).T                     # (E, 4H)
    w_hh_t = (w_hh * col_scale[:, None]).T                     # (H, 4H)
    bias = ((b_ih + b_hh) * col_scale)[None, :]                # (1, 4H)
    return w_ih_t, w_hh_t, bias


@jax.jit
def encoder_forward(obs_emb, w_ih_t, w_hh_t, bias):
    """Pallas forward for Encoder (single-layer LSTM).

    obs_emb: (T, B, E) f32
    w_ih_t/w_hh_t/bias: outputs of prepare_encoder_params (already packed).

    Returns final_h: (num_layers=1, B, H).
    """
    T, B, E = obs_emb.shape
    G = w_ih_t.shape[1]
    H = G // 4
    dt = obs_emb.dtype

    x2d = obs_emb.reshape(T * B, E)              # row index = t*B + b

    h_final = pl.pallas_call(
        _lstm_kernel,
        out_shape=jax.ShapeDtypeStruct((B, H), dt),
        grid_spec=pltpu.PrefetchScalarGridSpec(
            num_scalar_prefetch=0,
            grid=(1,),
            in_specs=[
                pl.BlockSpec((T * B, E), lambda i: (0, 0)),
                pl.BlockSpec((E, G), lambda i: (0, 0)),
                pl.BlockSpec((H, G), lambda i: (0, 0)),
                pl.BlockSpec((1, G), lambda i: (0, 0)),
            ],
            out_specs=pl.BlockSpec((B, H), lambda i: (0, 0)),
            scratch_shapes=[pltpu.VMEM((T * B, G), jnp.float32)],
        ),
        compiler_params=pltpu.CompilerParams(
            dimension_semantics=("arbitrary",),
        ),
    )(x2d, w_ih_t, w_hh_t, bias)

    # TODO(synk): num_layers > 1 and dropout > 0 not implemented (module
    # defaults are num_layers=1, dropout=0, which this forward covers).
    return h_final[None, :, :]                   # (1, B, H)


def lstm_reference(obs_emb, w_ih, w_hh, b_ih, b_hh):
    """Pure-JAX reference matching PyTorch nn.LSTM semantics."""
    T, B, E = obs_emb.shape
    H = w_hh.shape[1]
    h = jnp.zeros((B, H), jnp.float32)
    c = jnp.zeros((B, H), jnp.float32)
    bias = b_ih + b_hh

    def step(carry, x_t):
        h, c = carry
        gates = x_t @ w_ih.T + h @ w_hh.T + bias
        i = jax.nn.sigmoid(gates[:, 0 * H:1 * H])
        f = jax.nn.sigmoid(gates[:, 1 * H:2 * H])
        g = jnp.tanh(gates[:, 2 * H:3 * H])
        o = jax.nn.sigmoid(gates[:, 3 * H:4 * H])
        c = f * c + i * g
        h = o * jnp.tanh(c)
        return (h, c), None

    (h, _), _ = jax.lax.scan(step, (h, c), obs_emb)
    return h[None, :, :]


if __name__ == "__main__":
    # Shapes consistent with the module defaults: obs_len=8, batch=8,
    # embedding_dim=64, h_dim=64, num_layers=1.
    T, B, E, H = 8, 8, 64, 64

    key = jax.random.PRNGKey(0)
    k_x, k_wih, k_whh, k_bih, k_bhh = jax.random.split(key, 5)

    bound = 1.0 / jnp.sqrt(jnp.float32(H))
    obs_emb = jax.random.normal(k_x, (T, B, E), jnp.float32)
    # PyTorch nn.LSTM parameter layout: (4H, E) / (4H, H) / (4H,), gates (i,f,g,o).
    w_ih = jax.random.uniform(k_wih, (4 * H, E), jnp.float32, -bound, bound)
    w_hh = jax.random.uniform(k_whh, (4 * H, H), jnp.float32, -bound, bound)
    b_ih = jax.random.uniform(k_bih, (4 * H,), jnp.float32, -bound, bound)
    b_hh = jax.random.uniform(k_bhh, (4 * H,), jnp.float32, -bound, bound)

    # One-time parameter prep (outside the hot path), then the kernel call.
    w_ih_t, w_hh_t, bias = prepare_encoder_params(w_ih, w_hh, b_ih, b_hh)
    w_ih_t, w_hh_t, bias = jax.block_until_ready((w_ih_t, w_hh_t, bias))

    final_h = encoder_forward(obs_emb, w_ih_t, w_hh_t, bias)
    final_h = jax.block_until_ready(final_h)

    ref = lstm_reference(obs_emb, w_ih, w_hh, b_ih, b_hh)
    assert final_h.shape == (1, B, H), final_h.shape
    err = float(jnp.max(jnp.abs(final_h - ref)))
    assert jnp.allclose(final_h, ref, atol=2e-5, rtol=2e-5), err

    print("KERNEL_OK")
</pallas_src>

<mosaic_0001>
module attributes {stable_mosaic.version = 11 : i64} {
  func.func @_lstm_kernel(%arg0: i32, %arg1: memref<64x64xf32, #tpu.memory_space<vmem>>, %arg2: memref<64x256xf32, #tpu.memory_space<vmem>>, %arg3: memref<64x256xf32, #tpu.memory_space<vmem>>, %arg4: memref<1x256xf32, #tpu.memory_space<vmem>>, %arg5: memref<8x64xf32, #tpu.memory_space<vmem>>, %arg6: memref<64x256xf32, #tpu.memory_space<vmem>>) attributes {dimension_semantics = [#tpu.dimension_semantics<arbitrary>], iteration_bounds = array<i64: 1>, scalar_prefetch = 0 : i64, scratch_operands = 1 : i64, tpu.core_type = #tpu.core_type<tc>, window_params = [{pipeline_mode = #tpu.pipeline_mode<synchronous>, transform_indices = @transform_0, window_bounds = array<i64: 64, 64>}, {pipeline_mode = #tpu.pipeline_mode<synchronous>, transform_indices = @transform_1, window_bounds = array<i64: 64, 256>}, {pipeline_mode = #tpu.pipeline_mode<synchronous>, transform_indices = @transform_2, window_bounds = array<i64: 64, 256>}, {pipeline_mode = #tpu.pipeline_mode<synchronous>, transform_indices = @transform_3, window_bounds = array<i64: 1, 256>}, {pipeline_mode = #tpu.pipeline_mode<synchronous>, transform_indices = @transform_4, window_bounds = array<i64: 8, 64>}]} {
    %c0 = arith.constant 0 : index
    %c0_0 = arith.constant 0 : index
    %0 = vector.load %arg1[%c0, %c0_0] : memref<64x64xf32, #tpu.memory_space<vmem>>, vector<64x64xf32>
    %c0_1 = arith.constant 0 : index
    %c0_2 = arith.constant 0 : index
    %1 = vector.load %arg2[%c0_1, %c0_2] : memref<64x256xf32, #tpu.memory_space<vmem>>, vector<64x256xf32>
    %cst = arith.constant dense<0.000000e+00> : vector<64x256xf32>
    %2 = tpu.matmul %0, %1, %cst {dimension_numbers = #tpu.dot_dimension_numbers<[1], [0], [0], [1], [0, 0, 1, 1], [], []>} : vector<64x64xf32>, vector<64x256xf32>, vector<64x256xf32> -> vector<64x256xf32>
    %c0_3 = arith.constant 0 : index
    %c0_4 = arith.constant 0 : index
    %3 = vector.load %arg4[%c0_3, %c0_4] : memref<1x256xf32, #tpu.memory_space<vmem>>, vector<1x256xf32>
    %4 = vector.broadcast %3 : vector<1x256xf32> to vector<64x256xf32>
    %5 = arith.addf %2, %4 : vector<64x256xf32>
    %c0_5 = arith.constant 0 : index
    %c0_6 = arith.constant 0 : index
    %6 = vector.load %arg6[%c0_5, %c0_6] : memref<64x256xf32, #tpu.memory_space<vmem>>, vector<64x256xf32>
    tpu.vector_store %arg6[%c0_5, %c0_6], %5 {strides = array<i32>} : memref<64x256xf32, #tpu.memory_space<vmem>>, vector<64x256xf32>,
    %c0_7 = arith.constant 0 : index
    %c0_8 = arith.constant 0 : index
    %7 = vector.load %arg3[%c0_7, %c0_8] : memref<64x256xf32, #tpu.memory_space<vmem>>, vector<64x256xf32>
    %cst_9 = arith.constant 0.000000e+00 : f32
    %8 = vector.broadcast %cst_9 : f32 to vector<8x64xf32>
    %cst_10 = arith.constant 0.000000e+00 : f32
    %9 = vector.broadcast %cst_10 : f32 to vector<8x64xf32>
    %c0_11 = arith.constant 0 : index
    %c0_12 = arith.constant 0 : index
    %10 = vector.load %arg6[%c0_11, %c0_12] : memref<64x256xf32, #tpu.memory_space<vmem>>, vector<8x256xf32>
    %cst_13 = arith.constant dense<0.000000e+00> : vector<8x256xf32>
    %11 = tpu.matmul %8, %7, %cst_13 {dimension_numbers = #tpu.dot_dimension_numbers<[1], [0], [0], [1], [0, 0, 1, 1], [], []>} : vector<8x64xf32>, vector<64x256xf32>, vector<8x256xf32> -> vector<8x256xf32>
    %12 = arith.addf %10, %11 : vector<8x256xf32>
    %13 = math.tanh %12 : vector<8x256xf32>
    %14 = vector.extract_strided_slice %13 {offsets = [0, 0], sizes = [8, 64], strides = [1, 1]} : vector<8x256xf32> to vector<8x64xf32>
    %cst_14 = arith.constant 1.000000e+00 : f32
    %15 = vector.broadcast %cst_14 : f32 to vector<8x64xf32>
    %16 = arith.addf %14, %15 : vector<8x64xf32>
    %cst_15 = arith.constant 5.000000e-01 : f32
    %17 = vector.broadcast %cst_15 : f32 to vector<8x64xf32>
    %18 = arith.mulf %17, %16 : vector<8x64xf32>
    %19 = vector.extract_strided_slice %13 {offsets = [0, 64], sizes = [8, 64], strides = [1, 1]} : vector<8x256xf32> to vector<8x64xf32>
    %cst_16 = arith.constant 1.000000e+00 : f32
    %20 = vector.broadcast %cst_16 : f32 to vector<8x64xf32>
    %21 = arith.addf %19, %20 : vector<8x64xf32>
    %cst_17 = arith.constant 5.000000e-01 : f32
    %22 = vector.broadcast %cst_17 : f32 to vector<8x64xf32>
    %23 = arith.mulf %22, %21 : vector<8x64xf32>
    %24 = vector.extract_strided_slice %13 {offsets = [0, 128], sizes = [8, 64], strides = [1, 1]} : vector<8x256xf32> to vector<8x64xf32>
    %25 = vector.extract_strided_slice %13 {offsets = [0, 192], sizes = [8, 64], strides = [1, 1]} : vector<8x256xf32> to vector<8x64xf32>
    %cst_18 = arith.constant 1.000000e+00 : f32
    %26 = vector.broadcast %cst_18 : f32 to vector<8x64xf32>
    %27 = arith.addf %25, %26 : vector<8x64xf32>
    %cst_19 = arith.constant 5.000000e-01 : f32
    %28 = vector.broadcast %cst_19 : f32 to vector<8x64xf32>
    %29 = arith.mulf %28, %27 : vector<8x64xf32>
    %30 = arith.mulf %23, %9 : vector<8x64xf32>
    %31 = arith.mulf %18, %24 : vector<8x64xf32>
    %32 = arith.addf %30, %31 : vector<8x64xf32>
    %33 = math.tanh %32 : vector<8x64xf32>
    %34 = arith.mulf %29, %33 : vector<8x64xf32>
    %c8 = arith.constant 8 : index
    %c0_20 = arith.constant 0 : index
    %35 = vector.load %arg6[%c8, %c0_20] : memref<64x256xf32, #tpu.memory_space<vmem>>, vector<8x256xf32>
    %cst_21 = arith.constant dense<0.000000e+00> : vector<8x256xf32>
    %36 = tpu.matmul %34, %7, %cst_21 {dimension_numbers = #tpu.dot_dimension_numbers<[1], [0], [0], [1], [0, 0, 1, 1], [], []>} : vector<8x64xf32>, vector<64x256xf32>, vector<8x256xf32> -> vector<8x256xf32>
    %37 = arith.addf %35, %36 : vector<8x256xf32>
    %38 = math.tanh %37 : vector<8x256xf32>
    %39 = vector.extract_strided_slice %38 {offsets = [0, 0], sizes = [8, 64], strides = [1, 1]} : vector<8x256xf32> to vector<8x64xf32>
    %cst_22 = arith.constant 1.000000e+00 : f32
    %40 = vector.broadcast %cst_22 : f32 to vector<8x64xf32>
    %41 = arith.addf %39, %40 : vector<8x64xf32>
    %cst_23 = arith.constant 5.000000e-01 : f32
    %42 = vector.broadcast %cst_23 : f32 to vector<8x64xf32>
    %43 = arith.mulf %42, %41 : vector<8x64xf32>
    %44 = vector.extract_strided_slice %38 {offsets = [0, 64], sizes = [8, 64], strides = [1, 1]} : vector<8x256xf32> to vector<8x64xf32>
    %cst_24 = arith.constant 1.000000e+00 : f32
    %45 = vector.broadcast %cst_24 : f32 to vector<8x64xf32>
    %46 = arith.addf %44, %45 : vector<8x64xf32>
    %cst_25 = arith.constant 5.000000e-01 : f32
    %47 = vector.broadcast %cst_25 : f32 to vector<8x64xf32>
    %48 = arith.mulf %47, %46 : vector<8x64xf32>
    %49 = vector.extract_strided_slice %38 {offsets = [0, 128], sizes = [8, 64], strides = [1, 1]} : vector<8x256xf32> to vector<8x64xf32>
    %50 = vector.extract_strided_slice %38 {offsets = [0, 192], sizes = [8, 64], strides = [1, 1]} : vector<8x256xf32> to vector<8x64xf32>
    %cst_26 = arith.constant 1.000000e+00 : f32
    %51 = vector.broadcast %cst_26 : f32 to vector<8x64xf32>
    %52 = arith.addf %50, %51 : vector<8x64xf32>
    %cst_27 = arith.constant 5.000000e-01 : f32
    %53 = vector.broadcast %cst_27 : f32 to vector<8x64xf32>
    %54 = arith.mulf %53, %52 : vector<8x64xf32>
    %55 = arith.mulf %48, %32 : vector<8x64xf32>
    %56 = arith.mulf %43, %49 : vector<8x64xf32>
    %57 = arith.addf %55, %56 : vector<8x64xf32>
    %58 = math.tanh %57 : vector<8x64xf32>
    %59 = arith.mulf %54, %58 : vector<8x64xf32>
    %c16 = arith.constant 16 : index
    %c0_28 = arith.constant 0 : index
    %60 = vector.load %arg6[%c16, %c0_28] : memref<64x256xf32, #tpu.memory_space<vmem>>, vector<8x256xf32>
    %cst_29 = arith.constant dense<0.000000e+00> : vector<8x256xf32>
    %61 = tpu.matmul %59, %7, %cst_29 {dimension_numbers = #tpu.dot_dimension_numbers<[1], [0], [0], [1], [0, 0, 1, 1], [], []>} : vector<8x64xf32>, vector<64x256xf32>, vector<8x256xf32> -> vector<8x256xf32>
    %62 = arith.addf %60, %61 : vector<8x256xf32>
    %63 = math.tanh %62 : vector<8x256xf32>
    %64 = vector.extract_strided_slice %63 {offsets = [0, 0], sizes = [8, 64], strides = [1, 1]} : vector<8x256xf32> to vector<8x64xf32>
    %cst_30 = arith.constant 1.000000e+00 : f32
    %65 = vector.broadcast %cst_30 : f32 to vector<8x64xf32>
    %66 = arith.addf %64, %65 : vector<8x64xf32>
    %cst_31 = arith.constant 5.000000e-01 : f32
    %67 = vector.broadcast %cst_31 : f32 to vector<8x64xf32>
    %68 = arith.mulf %67, %66 : vector<8x64xf32>
    %69 = vector.extract_strided_slice %63 {offsets = [0, 64], sizes = [8, 64], strides = [1, 1]} : vector<8x256xf32> to vector<8x64xf32>
    %cst_32 = arith.constant 1.000000e+00 : f32
    %70 = vector.broadcast %cst_32 : f32 to vector<8x64xf32>
    %71 = arith.addf %69, %70 : vector<8x64xf32>
    %cst_33 = arith.constant 5.000000e-01 : f32
    %72 = vector.broadcast %cst_33 : f32 to vector<8x64xf32>
    %73 = arith.mulf %72, %71 : vector<8x64xf32>
    %74 = vector.extract_strided_slice %63 {offsets = [0, 128], sizes = [8, 64], strides = [1, 1]} : vector<8x256xf32> to vector<8x64xf32>
    %75 = vector.extract_strided_slice %63 {offsets = [0, 192], sizes = [8, 64], strides = [1, 1]} : vector<8x256xf32> to vector<8x64xf32>
    %cst_34 = arith.constant 1.000000e+00 : f32
    %76 = vector.broadcast %cst_34 : f32 to vector<8x64xf32>
    %77 = arith.addf %75, %76 : vector<8x64xf32>
    %cst_35 = arith.constant 5.000000e-01 : f32
    %78 = vector.broadcast %cst_35 : f32 to vector<8x64xf32>
    %79 = arith.mulf %78, %77 : vector<8x64xf32>
    %80 = arith.mulf %73, %57 : vector<8x64xf32>
    %81 = arith.mulf %68, %74 : vector<8x64xf32>
    %82 = arith.addf %80, %81 : vector<8x64xf32>
    %83 = math.tanh %82 : vector<8x64xf32>
    %84 = arith.mulf %79, %83 : vector<8x64xf32>
    %c24 = arith.constant 24 : index
    %c0_36 = arith.constant 0 : index
    %85 = vector.load %arg6[%c24, %c0_36] : memref<64x256xf32, #tpu.memory_space<vmem>>, vector<8x256xf32>
    %cst_37 = arith.constant dense<0.000000e+00> : vector<8x256xf32>
    %86 = tpu.matmul %84, %7, %cst_37 {dimension_numbers = #tpu.dot_dimension_numbers<[1], [0], [0], [1], [0, 0, 1, 1], [], []>} : vector<8x64xf32>, vector<64x256xf32>, vector<8x256xf32> -> vector<8x256xf32>
    %87 = arith.addf %85, %86 : vector<8x256xf32>
    %88 = math.tanh %87 : vector<8x256xf32>
    %89 = vector.extract_strided_slice %88 {offsets = [0, 0], sizes = [8, 64], strides = [1, 1]} : vector<8x256xf32> to vector<8x64xf32>
    %cst_38 = arith.constant 1.000000e+00 : f32
    %90 = vector.broadcast %cst_38 : f32 to vector<8x64xf32>
    %91 = arith.addf %89, %90 : vector<8x64xf32>
    %cst_39 = arith.constant 5.000000e-01 : f32
    %92 = vector.broadcast %cst_39 : f32 to vector<8x64xf32>
    %93 = arith.mulf %92, %91 : vector<8x64xf32>
    %94 = vector.extract_strided_slice %88 {offsets = [0, 64], sizes = [8, 64], strides = [1, 1]} : vector<8x256xf32> to vector<8x64xf32>
    %cst_40 = arith.constant 1.000000e+00 : f32
    %95 = vector.broadcast %cst_40 : f32 to vector<8x64xf32>
    %96 = arith.addf %94, %95 : vector<8x64xf32>
    %cst_41 = arith.constant 5.000000e-01 : f32
    %97 = vector.broadcast %cst_41 : f32 to vector<8x64xf32>
    %98 = arith.mulf %97, %96 : vector<8x64xf32>
    %99 = vector.extract_strided_slice %88 {offsets = [0, 128], sizes = [8, 64], strides = [1, 1]} : vector<8x256xf32> to vector<8x64xf32>
    %100 = vector.extract_strided_slice %88 {offsets = [0, 192], sizes = [8, 64], strides = [1, 1]} : vector<8x256xf32> to vector<8x64xf32>
    %cst_42 = arith.constant 1.000000e+00 : f32
    %101 = vector.broadcast %cst_42 : f32 to vector<8x64xf32>
    %102 = arith.addf %100, %101 : vector<8x64xf32>
    %cst_43 = arith.constant 5.000000e-01 : f32
    %103 = vector.broadcast %cst_43 : f32 to vector<8x64xf32>
    %104 = arith.mulf %103, %102 : vector<8x64xf32>
    %105 = arith.mulf %98, %82 : vector<8x64xf32>
    %106 = arith.mulf %93, %99 : vector<8x64xf32>
    %107 = arith.addf %105, %106 : vector<8x64xf32>
    %108 = math.tanh %107 : vector<8x64xf32>
    %109 = arith.mulf %104, %108 : vector<8x64xf32>
    %c32 = arith.constant 32 : index
    %c0_44 = arith.constant 0 : index
    %110 = vector.load %arg6[%c32, %c0_44] : memref<64x256xf32, #tpu.memory_space<vmem>>, vector<8x256xf32>
    %cst_45 = arith.constant dense<0.000000e+00> : vector<8x256xf32>
    %111 = tpu.matmul %109, %7, %cst_45 {dimension_numbers = #tpu.dot_dimension_numbers<[1], [0], [0], [1], [0, 0, 1, 1], [], []>} : vector<8x64xf32>, vector<64x256xf32>, vector<8x256xf32> -> vector<8x256xf32>
    %112 = arith.addf %110, %111 : vector<8x256xf32>
    %113 = math.tanh %112 : vector<8x256xf32>
    %114 = vector.extract_strided_slice %113 {offsets = [0, 0], sizes = [8, 64], strides = [1, 1]} : vector<8x256xf32> to vector<8x64xf32>
    %cst_46 = arith.constant 1.000000e+00 : f32
    %115 = vector.broadcast %cst_46 : f32 to vector<8x64xf32>
    %116 = arith.addf %114, %115 : vector<8x64xf32>
    %cst_47 = arith.constant 5.000000e-01 : f32
    %117 = vector.broadcast %cst_47 : f32 to vector<8x64xf32>
    %118 = arith.mulf %117, %116 : vector<8x64xf32>
    %119 = vector.extract_strided_slice %113 {offsets = [0, 64], sizes = [8, 64], strides = [1, 1]} : vector<8x256xf32> to vector<8x64xf32>
    %cst_48 = arith.constant 1.000000e+00 : f32
    %120 = vector.broadcast %cst_48 : f32 to vector<8x64xf32>
    %121 = arith.addf %119, %120 : vector<8x64xf32>
    %cst_49 = arith.constant 5.000000e-01 : f32
    %122 = vector.broadcast %cst_49 : f32 to vector<8x64xf32>
    %123 = arith.mulf %122, %121 : vector<8x64xf32>
    %124 = vector.extract_strided_slice %113 {offsets = [0, 128], sizes = [8, 64], strides = [1, 1]} : vector<8x256xf32> to vector<8x64xf32>
    %125 = vector.extract_strided_slice %113 {offsets = [0, 192], sizes = [8, 64], strides = [1, 1]} : vector<8x256xf32> to vector<8x64xf32>
    %cst_50 = arith.constant 1.000000e+00 : f32
    %126 = vector.broadcast %cst_50 : f32 to vector<8x64xf32>
    %127 = arith.addf %125, %126 : vector<8x64xf32>
    %cst_51 = arith.constant 5.000000e-01 : f32
    %128 = vector.broadcast %cst_51 : f32 to vector<8x64xf32>
    %129 = arith.mulf %128, %127 : vector<8x64xf32>
    %130 = arith.mulf %123, %107 : vector<8x64xf32>
    %131 = arith.mulf %118, %124 : vector<8x64xf32>
    %132 = arith.addf %130, %131 : vector<8x64xf32>
    %133 = math.tanh %132 : vector<8x64xf32>
    %134 = arith.mulf %129, %133 : vector<8x64xf32>
    %c40 = arith.constant 40 : index
    %c0_52 = arith.constant 0 : index
    %135 = vector.load %arg6[%c40, %c0_52] : memref<64x256xf32, #tpu.memory_space<vmem>>, vector<8x256xf32>
    %cst_53 = arith.constant dense<0.000000e+00> : vector<8x256xf32>
    %136 = tpu.matmul %134, %7, %cst_53 {dimension_numbers = #tpu.dot_dimension_numbers<[1], [0], [0], [1], [0, 0, 1, 1], [], []>} : vector<8x64xf32>, vector<64x256xf32>, vector<8x256xf32> -> vector<8x256xf32>
    %137 = arith.addf %135, %136 : vector<8x256xf32>
    %138 = math.tanh %137 : vector<8x256xf32>
    %139 = vector.extract_strided_slice %138 {offsets = [0, 0], sizes = [8, 64], strides = [1, 1]} : vector<8x256xf32> to vector<8x64xf32>
    %cst_54 = arith.constant 1.000000e+00 : f32
    %140 = vector.broadcast %cst_54 : f32 to vector<8x64xf32>
    %141 = arith.addf %139, %140 : vector<8x64xf32>
    %cst_55 = arith.constant 5.000000e-01 : f32
    %142 = vector.broadcast %cst_55 : f32 to vector<8x64xf32>
    %143 = arith.mulf %142, %141 : vector<8x64xf32>
    %144 = vector.extract_strided_slice %138 {offsets = [0, 64], sizes = [8, 64], strides = [1, 1]} : vector<8x256xf32> to vector<8x64xf32>
    %cst_56 = arith.constant 1.000000e+00 : f32
    %145 = vector.broadcast %cst_56 : f32 to vector<8x64xf32>
    %146 = arith.addf %144, %145 : vector<8x64xf32>
    %cst_57 = arith.constant 5.000000e-01 : f32
    %147 = vector.broadcast %cst_57 : f32 to vector<8x64xf32>
    %148 = arith.mulf %147, %146 : vector<8x64xf32>
    %149 = vector.extract_strided_slice %138 {offsets = [0, 128], sizes = [8, 64], strides = [1, 1]} : vector<8x256xf32> to vector<8x64xf32>
    %150 = vector.extract_strided_slice %138 {offsets = [0, 192], sizes = [8, 64], strides = [1, 1]} : vector<8x256xf32> to vector<8x64xf32>
    %cst_58 = arith.constant 1.000000e+00 : f32
    %151 = vector.broadcast %cst_58 : f32 to vector<8x64xf32>
    %152 = arith.addf %150, %151 : vector<8x64xf32>
    %cst_59 = arith.constant 5.000000e-01 : f32
    %153 = vector.broadcast %cst_59 : f32 to vector<8x64xf32>
    %154 = arith.mulf %153, %152 : vector<8x64xf32>
    %155 = arith.mulf %148, %132 : vector<8x64xf32>
    %156 = arith.mulf %143, %149 : vector<8x64xf32>
    %157 = arith.addf %155, %156 : vector<8x64xf32>
    %158 = math.tanh %157 : vector<8x64xf32>
    %159 = arith.mulf %154, %158 : vector<8x64xf32>
    %c48 = arith.constant 48 : index
    %c0_60 = arith.constant 0 : index
    %160 = vector.load %arg6[%c48, %c0_60] : memref<64x256xf32, #tpu.memory_space<vmem>>, vector<8x256xf32>
    %cst_61 = arith.constant dense<0.000000e+00> : vector<8x256xf32>
    %161 = tpu.matmul %159, %7, %cst_61 {dimension_numbers = #tpu.dot_dimension_numbers<[1], [0], [0], [1], [0, 0, 1, 1], [], []>} : vector<8x64xf32>, vector<64x256xf32>, vector<8x256xf32> -> vector<8x256xf32>
    %162 = arith.addf %160, %161 : vector<8x256xf32>
    %163 = math.tanh %162 : vector<8x256xf32>
    %164 = vector.extract_strided_slice %163 {offsets = [0, 0], sizes = [8, 64], strides = [1, 1]} : vector<8x256xf32> to vector<8x64xf32>
    %cst_62 = arith.constant 1.000000e+00 : f32
    %165 = vector.broadcast %cst_62 : f32 to vector<8x64xf32>
    %166 = arith.addf %164, %165 : vector<8x64xf32>
    %cst_63 = arith.constant 5.000000e-01 : f32
    %167 = vector.broadcast %cst_63 : f32 to vector<8x64xf32>
    %168 = arith.mulf %167, %166 : vector<8x64xf32>
    %169 = vector.extract_strided_slice %163 {offsets = [0, 64], sizes = [8, 64], strides = [1, 1]} : vector<8x256xf32> to vector<8x64xf32>
    %cst_64 = arith.constant 1.000000e+00 : f32
    %170 = vector.broadcast %cst_64 : f32 to vector<8x64xf32>
    %171 = arith.addf %169, %170 : vector<8x64xf32>
    %cst_65 = arith.constant 5.000000e-01 : f32
    %172 = vector.broadcast %cst_65 : f32 to vector<8x64xf32>
    %173 = arith.mulf %172, %171 : vector<8x64xf32>
    %174 = vector.extract_strided_slice %163 {offsets = [0, 128], sizes = [8, 64], strides = [1, 1]} : vector<8x256xf32> to vector<8x64xf32>
    %175 = vector.extract_strided_slice %163 {offsets = [0, 192], sizes = [8, 64], strides = [1, 1]} : vector<8x256xf32> to vector<8x64xf32>
    %cst_66 = arith.constant 1.000000e+00 : f32
    %176 = vector.broadcast %cst_66 : f32 to vector<8x64xf32>
    %177 = arith.addf %175, %176 : vector<8x64xf32>
    %cst_67 = arith.constant 5.000000e-01 : f32
    %178 = vector.broadcast %cst_67 : f32 to vector<8x64xf32>
    %179 = arith.mulf %178, %177 : vector<8x64xf32>
    %180 = arith.mulf %173, %157 : vector<8x64xf32>
    %181 = arith.mulf %168, %174 : vector<8x64xf32>
    %182 = arith.addf %180, %181 : vector<8x64xf32>
    %183 = math.tanh %182 : vector<8x64xf32>
    %184 = arith.mulf %179, %183 : vector<8x64xf32>
    %c56 = arith.constant 56 : index
    %c0_68 = arith.constant 0 : index
    %185 = vector.load %arg6[%c56, %c0_68] : memref<64x256xf32, #tpu.memory_space<vmem>>, vector<8x256xf32>
    %cst_69 = arith.constant dense<0.000000e+00> : vector<8x256xf32>
    %186 = tpu.matmul %184, %7, %cst_69 {dimension_numbers = #tpu.dot_dimension_numbers<[1], [0], [0], [1], [0, 0, 1, 1], [], []>} : vector<8x64xf32>, vector<64x256xf32>, vector<8x256xf32> -> vector<8x256xf32>
    %187 = arith.addf %185, %186 : vector<8x256xf32>
    %188 = math.tanh %187 : vector<8x256xf32>
    %189 = vector.extract_strided_slice %188 {offsets = [0, 0], sizes = [8, 64], strides = [1, 1]} : vector<8x256xf32> to vector<8x64xf32>
    %cst_70 = arith.constant 1.000000e+00 : f32
    %190 = vector.broadcast %cst_70 : f32 to vector<8x64xf32>
    %191 = arith.addf %189, %190 : vector<8x64xf32>
    %cst_71 = arith.constant 5.000000e-01 : f32
    %192 = vector.broadcast %cst_71 : f32 to vector<8x64xf32>
    %193 = arith.mulf %192, %191 : vector<8x64xf32>
    %194 = vector.extract_strided_slice %188 {offsets = [0, 64], sizes = [8, 64], strides = [1, 1]} : vector<8x256xf32> to vector<8x64xf32>
    %cst_72 = arith.constant 1.000000e+00 : f32
    %195 = vector.broadcast %cst_72 : f32 to vector<8x64xf32>
    %196 = arith.addf %194, %195 : vector<8x64xf32>
    %cst_73 = arith.constant 5.000000e-01 : f32
    %197 = vector.broadcast %cst_73 : f32 to vector<8x64xf32>
    %198 = arith.mulf %197, %196 : vector<8x64xf32>
    %199 = vector.extract_strided_slice %188 {offsets = [0, 128], sizes = [8, 64], strides = [1, 1]} : vector<8x256xf32> to vector<8x64xf32>
    %200 = vector.extract_strided_slice %188 {offsets = [0, 192], sizes = [8, 64], strides = [1, 1]} : vector<8x256xf32> to vector<8x64xf32>
    %cst_74 = arith.constant 1.000000e+00 : f32
    %201 = vector.broadcast %cst_74 : f32 to vector<8x64xf32>
    %202 = arith.addf %200, %201 : vector<8x64xf32>
    %cst_75 = arith.constant 5.000000e-01 : f32
    %203 = vector.broadcast %cst_75 : f32 to vector<8x64xf32>
    %204 = arith.mulf %203, %202 : vector<8x64xf32>
    %205 = arith.mulf %198, %182 : vector<8x64xf32>
    %206 = arith.mulf %193, %199 : vector<8x64xf32>
    %207 = arith.addf %205, %206 : vector<8x64xf32>
    %208 = math.tanh %207 : vector<8x64xf32>
    %209 = arith.mulf %204, %208 : vector<8x64xf32>
    %c0_76 = arith.constant 0 : index
    %c0_77 = arith.constant 0 : index
    %210 = vector.load %arg5[%c0_76, %c0_77] : memref<8x64xf32, #tpu.memory_space<vmem>>, vector<8x64xf32>
    tpu.vector_store %arg5[%c0_76, %c0_77], %209 {strides = array<i32>} : memref<8x64xf32, #tpu.memory_space<vmem>>, vector<8x64xf32>,
    return
  }
  func.func @transform_0(%arg0: i32) -> (i32, i32) {
    %c0_i32 = arith.constant 0 : i32
    %c0_i32_0 = arith.constant 0 : i32
    %c0_i32_1 = arith.constant 0 : i32
    return %c0_i32, %c0_i32_0 : i32, i32
  }
  func.func @transform_1(%arg0: i32) -> (i32, i32) {
    %c0_i32 = arith.constant 0 : i32
    %c0_i32_0 = arith.constant 0 : i32
    %c0_i32_1 = arith.constant 0 : i32
    return %c0_i32, %c0_i32_0 : i32, i32
  }
  func.func @transform_2(%arg0: i32) -> (i32, i32) {
    %c0_i32 = arith.constant 0 : i32
    %c0_i32_0 = arith.constant 0 : i32
    %c0_i32_1 = arith.constant 0 : i32
    return %c0_i32, %c0_i32_0 : i32, i32
  }
  func.func @transform_3(%arg0: i32) -> (i32, i32) {
    %c0_i32 = arith.constant 0 : i32
    %c0_i32_0 = arith.constant 0 : i32
    %c0_i32_1 = arith.constant 0 : i32
    return %c0_i32, %c0_i32_0 : i32, i32
  }
  func.func @transform_4(%arg0: i32) -> (i32, i32) {
    %c0_i32 = arith.constant 0 : i32
    %c0_i32_0 = arith.constant 0 : i32
    %c0_i32_1 = arith.constant 0 : i32
    return %c0_i32, %c0_i32_0 : i32, i32
  }
}

</mosaic_0001>

<bundles_post_ra>
// kernel: encoder_forward.1
= control target key start
LH: loop header
LB: loop body
LE: loop exit
PB: predicated region body
PF: predicated region fallthrough
CT: control target
= control target key end

     0   :  { %9 = vsyncpa [#allocation4], 0  ;;  %s1506_s0 = inlined_call_operand.hbm [shape: f32[64,64], index: 0, kind: input, shape index: {}]   ;;  %s1507_s1 = inlined_call_operand.hbm [shape: f32[64,256], index: 1, kind: input, shape index: {}]   ;;  %s1508_s2 = inlined_call_operand.hbm [shape: f32[64,256], index: 2, kind: input, shape index: {}]   ;;  %s1509_s3 = inlined_call_operand.vmem [shape: f32[1,256], index: 3, kind: input, shape index: {}]   ;;  %s1510_s4 = inlined_call_operand.hbm [shape: f32[8,64], index: 4, kind: output, shape index: {}]  }
   0x1   :  { %10 = vsyncpa [#allocation7], 0 }
   0x2   :  { %11 = vsyncpa [#allocation5], 0  ;;  %s1203_s15 = smov [#allocation6]  }
   0x3   :  { %s29_s16 = sshll.u32 %s1203_s15, 4  ;;  %s30_s16 = int_to_ptr.vmem [resolvable:$true] %s29_s16 }
   0x4   :  { %s1125_s17 = scalar_lea.vmem %s30_s16, 2048  ;;  %p1130_p1 = scmp.lt.s32.totalorder %s30_s16, %s30_s16 }
   0x5   :  { %p1126_p0 = scmp.ne.s32.totalorder %s30_s16, %s1125_s17  ;;  %p1131_p2 = scmp.lt.s32.totalorder %s1125_s17, %s1125_s17 }
   0x7   :  { %p1132_p3 = por %p1131_p2, %p1130_p1 }
   0x9   :  { %p1133_p4 = pnand %p1132_p3, %p1126_p0 }
   0xb   :  { %1136 = shalt.err (!%p1133_p4)
}
   0xc   :  { %s1204_s18 = smov 256   ;;  %s1205_s19 = smov 16  }
   0xd   :  { %35 = dma.hbm_to_vmem [thread:$0]  %s1507_s1, 2048, %s30_s16, [#allocation7], %s1204_s18, %s1204_s18, %s1205_s19  }
   0xe   :  { %s1206_s22 = smov [#allocation3]  }
   0xf   :  { %s17_s23 = sshll.u32 %s1206_s22, 4  ;;  %s18_s23 = int_to_ptr.vmem [resolvable:$true] %s17_s23 }
  0x10   :  { %s1145_s24 = scalar_lea.vmem %s18_s23, 1024  ;;  %p1150_p6 = scmp.lt.s32.totalorder %s18_s23, %s18_s23 }
  0x11   :  { %p1146_p5 = scmp.ne.s32.totalorder %s18_s23, %s1145_s24  ;;  %p1151_p7 = scmp.lt.s32.totalorder %s1145_s24, %s1145_s24 }
  0x13   :  { %p1152_p8 = por %p1151_p7, %p1150_p6 }
  0x15   :  { %p1153_p9 = pnand %p1152_p8, %p1146_p5 }
  0x17   :  { %1156 = shalt.err (!%p1153_p9)
}
  0x18   :  { %s1207_s25 = smov 128   ;;  %s1208_s26 = smov 8  }
  0x19   :  { %23 = dma.hbm_to_vmem [thread:$0]  %s1506_s0, 1024, %s18_s23, [#allocation4], %s1207_s25, %s1207_s25, %s1208_s26  }
  0x1a   :  { %s1209_s29 = smov [#allocation8]  }
  0x1b   :  { %s41_s30 = sshll.u32 %s1209_s29, 4  ;;  %s42_s30 = int_to_ptr.vmem [resolvable:$true] %s41_s30 }
  0x1c   :  { %s1165_s1 = scalar_lea.vmem %s42_s30, 2048  ;;  %p1170_p11 = scmp.lt.s32.totalorder %s42_s30, %s42_s30 }
  0x1d   :  { %p1166_p10 = scmp.ne.s32.totalorder %s42_s30, %s1165_s1  ;;  %p1171_p12 = scmp.lt.s32.totalorder %s1165_s1, %s1165_s1 }
  0x1f   :  { %p1172_p13 = por %p1171_p12, %p1170_p11 }
  0x21   :  { %p1173_p0 = pnand %p1172_p13, %p1166_p10 }
  0x23   :  { %1176 = shalt.err (!%p1173_p0)
}
  0x24   :  { %47 = dma.hbm_to_vmem [thread:$0]  %s1508_s2, 2048, %s42_s30, [#allocation7], %s1204_s18, %s1204_s18, %s1205_s19  }
  0x25   :  { %1197 = dma.done.wait [#allocation4], 1024  }
  0x26   :  { %1198 = vsyncadd [#allocation4], 4294966272 }
  0x27   :  { %1199 = dma.done.wait [#allocation7], 4096  }
  0x28   :  { %1200 = vsyncadd [#allocation7], 4294963200  ;;  %v1210_v0 = vmov 0.0   ;;  %v82_v1 = vld [vmem:[#allocation6 + $0x78] sm:$0xff]  ;;  %v81_v3 = vld [vmem:[#allocation6 + $0x70] sm:$0xff]  ;;  %vm95_vm0 = vcmask 523264   ;;  %v85_v34 = vlaneseq }
  0x29   :  { %184 = vmatprep.mubr.f32.mxu0 %v1210_v0  ;;  %334 = vmatprep.mubr.f32.mxu1 %v1210_v0  ;;  %v1249_v2 = vld [vmem:[#allocation8 + $0x78] sm:$0xff]  ;;  %v1252_v4 = vld [vmem:[#allocation8 + $0x70] sm:$0xff]  ;;  %v80_v5 = vld [vmem:[#allocation6 + $0x68] sm:$0xff]  ;;  %s1212_s7 = smov [#allocation9]  }
  0x2a   :  { %136 = vmatprep.subr.mxu0 %v82_v1  ;;  %286 = vmatprep.subr.mxu1 %v1249_v2  ;;  %v1254_v6 = vld [vmem:[#allocation8 + $0x68] sm:$0xff]  ;;  %v79_v7 = vld [vmem:[#allocation6 + $0x60] sm:$0xff]  ;;  %v78_v9 = vld [vmem:[#allocation6 + $0x58] sm:$0xff]  ;;  %v86_v35 = vshrl.u32 %v85_v34, 7  ;;  %s1034_s8 = sshll.u32 %s1212_s7, 4  ;;  %s1035_s8 = int_to_ptr.vmem [resolvable:$true] %s1034_s8 }
  0x2b   :  { %137 = vmatpush1.msra.mxu0 %v81_v3  ;;  %287 = vmatpush1.msra.mxu1 %v1252_v4  ;;  %v1257_v8 = vld [vmem:[#allocation8 + $0x60] sm:$0xff]  ;;  %v1260_v10 = vld [vmem:[#allocation8 + $0x58] sm:$0xff]  ;;  %v77_v11 = vld [vmem:[#allocation6 + $0x50] sm:$0xff]  ;;  %s1177_s9 = scalar_lea.vmem %s1035_s8, 128  ;;  %p1182_p2 = scmp.lt.s32.totalorder %s1035_s8, %s1035_s8 }
  0x2c   :  { %138 = vmatprep.subr.mxu0 %v80_v5  ;;  %288 = vmatprep.subr.mxu1 %v1254_v6  ;;  %v1262_v12 = vld [vmem:[#allocation8 + $0x50] sm:$0xff]  ;;  %v76_v13 = vld [vmem:[#allocation6 + $0x48] sm:$0xff]  ;;  %v75_v15 = vld [vmem:[#allocation6 + $0x40] sm:$0xff]  ;;  %v87_v36 = vsub.s32 0, %v86_v35  ;;  %v91_v38 = vsub.s32 1, %v86_v35  ;;  %p1178_p1 = scmp.ne.s32.totalorder %s1035_s8, %s1177_s9  ;;  %p1183_p3 = scmp.lt.s32.totalorder %s1177_s9, %s1177_s9 }
  0x2d   :  { %139 = vmatpush1.msra.mxu0 %v79_v7  ;;  %289 = vmatpush1.msra.mxu1 %v1257_v8  ;;  %v1265_v14 = vld [vmem:[#allocation8 + $0x48] sm:$0xff]  ;;  %v1268_v16 = vld [vmem:[#allocation8 + $0x40] sm:$0xff]  ;;  %v74_v17 = vld [vmem:[#allocation6 + $0x38] sm:$0xff] }
  0x2e   :  { %140 = vmatprep.subr.mxu0 %v78_v9  ;;  %290 = vmatprep.subr.mxu1 %v1260_v10  ;;  %v1271_v18 = vld [vmem:[#allocation8 + $0x38] sm:$0xff]  ;;  %v73_v19 = vld [vmem:[#allocation6 + $0x30] sm:$0xff]  ;;  %v72_v21 = vld [vmem:[#allocation6 + $0x28] sm:$0xff]  ;;  %p1184_p4 = por %p1183_p3, %p1182_p2 }
  0x2f   :  { %141 = vmatpush1.msra.mxu0 %v77_v11  ;;  %291 = vmatpush1.msra.mxu1 %v1262_v12  ;;  %v1274_v20 = vld [vmem:[#allocation8 + $0x30] sm:$0xff]  ;;  %v1277_v22 = vld [vmem:[#allocation8 + $0x28] sm:$0xff]  ;;  %v71_v23 = vld [vmem:[#allocation6 + $0x20] sm:$0xff] }
  0x30   :  { %142 = vmatprep.subr.mxu0 %v76_v13  ;;  %292 = vmatprep.subr.mxu1 %v1265_v14  ;;  %v1280_v24 = vld [vmem:[#allocation8 + $0x20] sm:$0xff]  ;;  %v70_v25 = vld [vmem:[#allocation6 + $0x18] sm:$0xff]  ;;  %v69_v27 = vld [vmem:[#allocation6 + $0x10] sm:$0xff]  ;;  %p1185_p5 = pnand %p1184_p4, %p1178_p1 }
  0x31   :  { %143 = vmatpush1.msra.mxu0 %v75_v15  ;;  %293 = vmatpush1.msra.mxu1 %v1268_v16  ;;  %v1283_v26 = vld [vmem:[#allocation8 + $0x18] sm:$0xff]  ;;  %v1286_v28 = vld [vmem:[#allocation8 + $0x10] sm:$0xff]  ;;  %v68_v29 = vld [vmem:[#allocation6 + $0x8] sm:$0xff] }
  0x32   :  { %144 = vmatprep.subr.mxu0 %v74_v17  ;;  %294 = vmatprep.subr.mxu1 %v1271_v18  ;;  %v1289_v30 = vld [vmem:[#allocation8 + $0x8] sm:$0xff]  ;;  %v67_v31 = vld [vmem:[#allocation6] sm:$0xff]  ;;  %v66_v34 = vld [vmem:[#allocation3 + $0x38] sm:$0xff] }
  0x33   :  { %145 = vmatpush1.msra.mxu0 %v73_v19  ;;  %295 = vmatpush1.msra.mxu1 %v1274_v20  ;;  %v1292_v32 = vld [vmem:[#allocation8] sm:$0xff]  ;;  %v60_v54 = vld [vmem:[#allocation3 + $0x8] sm:$0xff] }
  0x34   :  { %146 = vmatprep.subr.mxu0 %v72_v21  ;;  %296 = vmatprep.subr.mxu1 %v1277_v22  ;;  %v59_v33 = vld [vmem:[#allocation3] sm:$0xff] }
  0x35   :  { %147 = vmatpush1.msra.mxu0 %v71_v23  ;;  %297 = vmatpush1.msra.mxu1 %v1280_v24  ;;  %v83_v37 = vld [vmem:[%s1509_s3] sm:$0x3]  ;;  %s1211_s3 = smov 64  }
  0x36   :  { %148 = vmatprep.subr.mxu0 %v70_v25  ;;  %298 = vmatprep.subr.mxu1 %v1283_v26  ;;  %v1338_v39 = vrot.slane %v83_v37, %v87_v36  ;;  %v1340_v40 = vrot.slane %v83_v37, %v91_v38  ;;  %v61_v25 = vld [vmem:[#allocation3 + $0x10] sm:$0xff] }
  0x37   :  { %149 = vmatpush1.msra.mxu0 %v69_v27  ;;  %299 = vmatpush1.msra.mxu1 %v1286_v28  ;;  %v62_v27 = vld [vmem:[#allocation3 + $0x18] sm:$0xff] }
  0x38   :  { %150 = vmatprep.subr.mxu0 %v68_v29  ;;  %300 = vmatprep.subr.mxu1 %v1289_v30  ;;  %v63_v29 = vld [vmem:[#allocation3 + $0x20] sm:$0xff] }
  0x39   :  { %151 = vmatpush1.msra.mxu0 %v67_v31  ;;  %301 = vmatpush1.msra.mxu1 %v1292_v32  ;;  %v64_v31 = vld [vmem:[#allocation3 + $0x28] sm:$0xff] }
  0x3a   :  { %1044 = vmatmul.mubr.msk.f32.vlgmr.msra.gmra.mxu0 %vm95_vm0, %v59_v33  ;;  %335 = vmatmul.mubr.f32.vlgmr.msra.gmra.mxu1 %v1210_v0  ;;  %v65_v33 = vld [vmem:[#allocation3 + $0x30] sm:$0xff] }
  0x3b   :  { %381 = vmatprep.subr.mxu1 %v1249_v2  ;;  %190 = vmatprep.mubr.f32.mxu0 %v1210_v0 }
  0x3c   :  { %382 = vmatpush1.msra.mxu1 %v1252_v4  ;;  %429 = vmatprep.mubr.f32.mxu1 %v1210_v0 }
  0x3d   :  { %383 = vmatprep.subr.mxu1 %v1254_v6  ;;  %476 = vmatprep.subr.mxu0 %v1249_v2 }
  0x3e   :  { %384 = vmatpush1.msra.mxu1 %v1257_v8  ;;  %477 = vmatpush1.msra.mxu0 %v1252_v4 }
  0x3f   :  { %385 = vmatprep.subr.mxu1 %v1260_v10  ;;  %478 = vmatprep.subr.mxu0 %v1254_v6 }
  0x40   :  { %386 = vmatpush1.msra.mxu1 %v1262_v12  ;;  %479 = vmatpush1.msra.mxu0 %v1257_v8 }
  0x41   :  { %387 = vmatprep.subr.mxu1 %v1265_v14  ;;  %480 = vmatprep.subr.mxu0 %v1260_v10 }
  0x42   :  { %388 = vmatpush1.msra.mxu1 %v1268_v16  ;;  %481 = vmatpush1.msra.mxu0 %v1262_v12 }
  0x43   :  { %389 = vmatprep.subr.mxu1 %v1271_v18  ;;  %482 = vmatprep.subr.mxu0 %v1265_v14 }
  0x44   :  { %390 = vmatpush1.msra.mxu1 %v1274_v20  ;;  %483 = vmatpush1.msra.mxu0 %v1268_v16 }
  0x45   :  { %391 = vmatprep.subr.mxu1 %v1277_v22  ;;  %484 = vmatprep.subr.mxu0 %v1271_v18 }
  0x46   :  { %392 = vmatpush1.msra.mxu1 %v1280_v24  ;;  %485 = vmatpush1.msra.mxu0 %v1274_v20 }
  0x47   :  { %393 = vmatprep.subr.mxu1 %v1283_v26  ;;  %486 = vmatprep.subr.mxu0 %v1277_v22 }
  0x48   :  { %394 = vmatpush1.msra.mxu1 %v1286_v28  ;;  %487 = vmatpush1.msra.mxu0 %v1280_v24 }
  0x49   :  { %395 = vmatprep.subr.mxu1 %v1289_v30  ;;  %488 = vmatprep.subr.mxu0 %v1283_v26 }
  0x4a   :  { %396 = vmatpush1.msra.mxu1 %v1292_v32  ;;  %489 = vmatpush1.msra.mxu0 %v1286_v28 }
  0x4b   :  { %490 = vmatprep.subr.mxu0 %v1289_v30  ;;  %571 = vmatprep.subr.mxu1 %v1249_v2 }
  0x4c   :  { %491 = vmatpush1.msra.mxu0 %v1292_v32 }
  0x4d   :  { %666 = vmatprep.subr.mxu0 %v1249_v2  ;;  %1045 = vmatmul.mubr.msk.f32.gmra.mxu0 %vm95_vm0, %v60_v54 }
  0x4e   :  { %196 = vmatprep.mubr.f32.mxu0 %v1210_v0 }
  0x51   :  { %1046 = vmatmul.mubr.msk.f32.gmra.mxu0 %vm95_vm0, %v61_v25 }
  0x52   :  { %202 = vmatprep.mubr.f32.mxu0 %v1210_v0 }
  0x55   :  { %1047 = vmatmul.mubr.msk.f32.gmra.mxu0 %vm95_vm0, %v62_v27 }
  0x56   :  { %208 = vmatprep.mubr.f32.mxu0 %v1210_v0 }
  0x59   :  { %1048 = vmatmul.mubr.msk.f32.gmra.mxu0 %vm95_vm0, %v63_v29 }
  0x5a   :  { %214 = vmatprep.mubr.f32.mxu0 %v1210_v0 }
  0x5d   :  { %1049 = vmatmul.mubr.msk.f32.gmra.mxu0 %vm95_vm0, %v64_v31 }
  0x5e   :  { %220 = vmatprep.mubr.f32.mxu0 %v1210_v0 }
  0x61   :  { %1050 = vmatmul.mubr.msk.f32.gmra.mxu0 %vm95_vm0, %v65_v33 }
  0x62   :  { %226 = vmatprep.mubr.f32.mxu0 %v1210_v0 }
  0x65   :  { %1051 = vmatmul.mubr.msk.f32.gmra.mxu0 %vm95_vm0, %v66_v34 }
  0x66   :  { %524 = vmatprep.mubr.f32.mxu0 %v1210_v0 }
  0xfa   :  { %v186_v41 = vpop.f32.mrf.mxu0  ;;  %v336_v42 = vpop.f32.mrf.mxu1 }
  0xfb   :  { %v187_v43 = vadd.f32 %v186_v41, %v1338_v39 }
  0xfc   :  { %v188_v44 = vpop.f32.mrf.mxu0  ;;  %v338_v47 = vpop.f32.mrf.mxu1 }
  0xfd   :  { %v341_v45 = vadd.f32 %v336_v42, %v187_v43  ;;  %v189_v46 = vadd.f32 %v188_v44, %v1340_v40 }
  0xff   :  { %1069 = vtanh.f32 %v341_v45  ;;  %v342_v48 = vadd.f32 %v338_v47, %v189_v46 }
 0x101   :  { %1071 = vtanh.f32 %v342_v48 }
 0x10c   :  { %v1070_v49 = vpop.eup %1069 }
 0x10d   :  { %v345_v50 = vadd.f32 1.0, %v1070_v49  ;;  %v192_v63 = vpop.f32.mrf.mxu0 }
 0x10e   :  { %v1072_v52 = vpop.eup %1071  ;;  %v193_v1 = vadd.f32 %v192_v63, %v1338_v39 }
 0x10f   :  { %v346_v51 = vmul.f32 0.5, %v345_v50  ;;  %v347_v58 = vadd.f32 1.0, %v1072_v52  ;;  %v194_v3 = vpop.f32.mrf.mxu0 }
 0x110   :  { %v195_v7 = vadd.f32 %v194_v3, %v1340_v40 }
 0x111   :  { %v350_v53 = vmul.f32 %v1072_v52, %v346_v51  ;;  %v349_v55 = vmul.f32 0.0, %v346_v51  ;;  %v348_v59 = vmul.f32 0.5, %v347_v58  ;;  %v198_v45 = vpop.f32.mrf.mxu0 }
 0x113   :  { %352 = vrot.lane.b32.xlu0 %v350_v53, %s1211_s3  ;;  %v200_v46 = vpop.f32.mrf.mxu0 }
 0x115   :  { %v204_v47 = vpop.f32.mrf.mxu0 }
 0x116   :  { %v205_v25 = vadd.f32 %v204_v47, %v1338_v39 }
 0x117   :  { %v206_v48 = vpop.f32.mrf.mxu0 }
 0x118   :  { %v207_v29 = vadd.f32 %v206_v48, %v1340_v40 }
 0x119   :  { %v1400_v49 = vpop.f32.mrf.mxu0 }
 0x11b   :  { %v1402_v50 = vpop.f32.mrf.mxu0 }
 0x11d   :  { %v1404_v51 = vpop.f32.mrf.mxu0 }
 0x11f   :  { %v1406_v52 = vpop.f32.mrf.mxu0 }
 0x121   :  { %v1408_v53 = vpop.f32.mrf.mxu0 }
 0x123   :  { %v1410_v54 = vpop.f32.mrf.mxu0 }
 0x185   :  { %v353_v56 = vpop.permute.xlu0 %352 }
 0x186   :  { %v355_v57 = vadd.f32 %v353_v56, %v349_v55  ;;  %v1412_v55 = vpop.f32.mrf.mxu0 }
 0x188   :  { %1073 = vtanh.f32 %v355_v57  ;;  %v1414_v56 = vpop.f32.mrf.mxu0 }
 0x195   :  { %v1074_v60 = vpop.eup %1073 }
 0x196   :  { %v357_v61 = vmul.f32 %v1074_v60, %v348_v59  ;;  %v201_v59 = vadd.f32 %v200_v46, %v1340_v40 }
 0x198   :  { %361 = vrot.lane.b32.xlu0 %v357_v61, %s1211_s3 }
 0x20a   :  { %v362_v62 = vpop.permute.xlu0 %361 }
 0x20b   :  { %1052 = vmatmul.mubr.msk.f32.vlgmr.msra.gmra.mxu1 %vm95_vm0, %v362_v62 }
 0x20c   :  { %572 = vmatpush1.msra.mxu1 %v1252_v4  ;;  %619 = vmatprep.mubr.f32.mxu1 %v1210_v0 }
 0x20d   :  { %573 = vmatprep.subr.mxu1 %v1254_v6 }
 0x20e   :  { %574 = vmatpush1.msra.mxu1 %v1257_v8 }
 0x20f   :  { %575 = vmatprep.subr.mxu1 %v1260_v10 }
 0x210   :  { %576 = vmatpush1.msra.mxu1 %v1262_v12 }
 0x211   :  { %577 = vmatprep.subr.mxu1 %v1265_v14 }
 0x212   :  { %578 = vmatpush1.msra.mxu1 %v1268_v16 }
 0x213   :  { %579 = vmatprep.subr.mxu1 %v1271_v18 }
 0x214   :  { %580 = vmatpush1.msra.mxu1 %v1274_v20 }
 0x215   :  { %581 = vmatprep.subr.mxu1 %v1277_v22 }
 0x216   :  { %582 = vmatpush1.msra.mxu1 %v1280_v24 }
 0x217   :  { %583 = vmatprep.subr.mxu1 %v1283_v26 }
 0x218   :  { %584 = vmatpush1.msra.mxu1 %v1286_v28 }
 0x219   :  { %585 = vmatprep.subr.mxu1 %v1289_v30 }
 0x21a   :  { %586 = vmatpush1.msra.mxu1 %v1292_v32 }
 0x21b   :  { %761 = vmatprep.subr.mxu1 %v1249_v2 }
 0x2cb   :  { %v431_v5 = vpop.f32.mrf.mxu1 }
 0x2cc   :  { %v436_v9 = vadd.f32 %v431_v5, %v193_v1 }
 0x2cd   :  { %v433_v11 = vpop.f32.mrf.mxu1 }
 0x2ce   :  { %1075 = vtanh.f32 %v436_v9  ;;  %v437_v13 = vadd.f32 %v433_v11, %v195_v7 }
 0x2d0   :  { %1077 = vtanh.f32 %v437_v13 }
 0x2db   :  { %v1076_v15 = vpop.eup %1075 }
 0x2dc   :  { %v440_v17 = vadd.f32 1.0, %v1076_v15 }
 0x2dd   :  { %v1078_v21 = vpop.eup %1077 }
 0x2de   :  { %v441_v19 = vmul.f32 0.5, %v440_v17  ;;  %v442_v38 = vadd.f32 1.0, %v1078_v21 }
 0x2e0   :  { %v445_v23 = vmul.f32 %v1078_v21, %v441_v19  ;;  %v444_v35 = vmul.f32 %v441_v19, %v355_v57  ;;  %v443_v41 = vmul.f32 0.5, %v442_v38  ;;  %v199_v57 = vadd.f32 %v198_v45, %v1338_v39 }
 0x2e2   :  { %447 = vrot.lane.b32.xlu1 %v445_v23, %s1211_s3 }
 0x354   :  { %v448_v36 = vpop.permute.xlu1 %447 }
 0x355   :  { %v450_v37 = vadd.f32 %v448_v36, %v444_v35 }
 0x357   :  { %1079 = vtanh.f32 %v450_v37 }
 0x364   :  { %v1080_v42 = vpop.eup %1079 }
 0x365   :  { %v452_v43 = vmul.f32 %v1080_v42, %v443_v41 }
 0x367   :  { %456 = vrot.lane.b32.xlu1 %v452_v43, %s1211_s3 }
 0x3d9   :  { %v457_v44 = vpop.permute.xlu1 %456 }
 0x3da   :  { %1053 = vmatmul.mubr.msk.f32.vlgmr.msra.gmra.mxu0 %vm95_vm0, %v457_v44 }
 0x3db   :  { %667 = vmatpush1.msra.mxu0 %v1252_v4  ;;  %714 = vmatprep.mubr.f32.mxu0 %v1210_v0 }
 0x3dc   :  { %668 = vmatprep.subr.mxu0 %v1254_v6 }
 0x3dd   :  { %669 = vmatpush1.msra.mxu0 %v1257_v8 }
 0x3de   :  { %670 = vmatprep.subr.mxu0 %v1260_v10 }
 0x3df   :  { %671 = vmatpush1.msra.mxu0 %v1262_v12 }
 0x3e0   :  { %672 = vmatprep.subr.mxu0 %v1265_v14 }
 0x3e1   :  { %673 = vmatpush1.msra.mxu0 %v1268_v16 }
 0x3e2   :  { %674 = vmatprep.subr.mxu0 %v1271_v18 }
 0x3e3   :  { %675 = vmatpush1.msra.mxu0 %v1274_v20 }
 0x3e4   :  { %676 = vmatprep.subr.mxu0 %v1277_v22 }
 0x3e5   :  { %677 = vmatpush1.msra.mxu0 %v1280_v24 }
 0x3e6   :  { %678 = vmatprep.subr.mxu0 %v1283_v26 }
 0x3e7   :  { %679 = vmatpush1.msra.mxu0 %v1286_v28 }
 0x3e8   :  { %680 = vmatprep.subr.mxu0 %v1289_v30 }
 0x3e9   :  { %681 = vmatpush1.msra.mxu0 %v1292_v32 }
 0x3ea   :  { %856 = vmatprep.subr.mxu0 %v1249_v2 }
 0x49a   :  { %v526_v58 = vpop.f32.mrf.mxu0 }
 0x49b   :  { %v531_v60 = vadd.f32 %v526_v58, %v199_v57  ;;  %v211_v57 = vadd.f32 %v1400_v49, %v1338_v39 }
 0x49c   :  { %v528_v61 = vpop.f32.mrf.mxu0 }
 0x49d   :  { %1081 = vtanh.f32 %v531_v60  ;;  %v532_v62 = vadd.f32 %v528_v61, %v201_v59  ;;  %v213_v59 = vadd.f32 %v1402_v50, %v1340_v40 }
 0x49f   :  { %1083 = vtanh.f32 %v532_v62 }
 0x4aa   :  { %v1082_v63 = vpop.eup %1081 }
 0x4ab   :  { %v535_v1 = vadd.f32 1.0, %v1082_v63 }
 0x4ac   :  { %v1084_v5 = vpop.eup %1083 }
 0x4ad   :  { %v536_v3 = vmul.f32 0.5, %v535_v1  ;;  %v537_v15 = vadd.f32 1.0, %v1084_v5 }
 0x4af   :  { %v540_v7 = vmul.f32 %v1084_v5, %v536_v3  ;;  %v539_v9 = vmul.f32 %v536_v3, %v450_v37  ;;  %v538_v17 = vmul.f32 0.5, %v537_v15 }
 0x4b1   :  { %542 = vrot.lane.b32.xlu0 %v540_v7, %s1211_s3 }
 0x523   :  { %v543_v11 = vpop.permute.xlu0 %542 }
 0x524   :  { %v545_v13 = vadd.f32 %v543_v11, %v539_v9 }
 0x526   :  { %1085 = vtanh.f32 %v545_v13 }
 0x533   :  { %v1086_v19 = vpop.eup %1085 }
 0x534   :  { %v547_v21 = vmul.f32 %v1086_v19, %v538_v17 }
 0x536   :  { %551 = vrot.lane.b32.xlu1 %v547_v21, %s1211_s3 }
 0x5a8   :  { %v552_v23 = vpop.permute.xlu1 %551 }
 0x5a9   :  { %1054 = vmatmul.mubr.msk.f32.vlgmr.msra.gmra.mxu1 %vm95_vm0, %v552_v23  ;;  %v223_v23 = vadd.f32 %v1408_v53, %v1338_v39 }
 0x5aa   :  { %762 = vmatpush1.msra.mxu1 %v1252_v4  ;;  %809 = vmatprep.mubr.f32.mxu1 %v1210_v0 }
 0x5ab   :  { %763 = vmatprep.subr.mxu1 %v1254_v6 }
 0x5ac   :  { %764 = vmatpush1.msra.mxu1 %v1257_v8 }
 0x5ad   :  { %765 = vmatprep.subr.mxu1 %v1260_v10 }
 0x5ae   :  { %766 = vmatpush1.msra.mxu1 %v1262_v12 }
 0x5af   :  { %767 = vmatprep.subr.mxu1 %v1265_v14 }
 0x5b0   :  { %768 = vmatpush1.msra.mxu1 %v1268_v16 }
 0x5b1   :  { %769 = vmatprep.subr.mxu1 %v1271_v18 }
 0x5b2   :  { %770 = vmatpush1.msra.mxu1 %v1274_v20 }
 0x5b3   :  { %771 = vmatprep.subr.mxu1 %v1277_v22 }
 0x5b4   :  { %772 = vmatpush1.msra.mxu1 %v1280_v24 }
 0x5b5   :  { %773 = vmatprep.subr.mxu1 %v1283_v26 }
 0x5b6   :  { %774 = vmatpush1.msra.mxu1 %v1286_v28 }
 0x5b7   :  { %775 = vmatprep.subr.mxu1 %v1289_v30 }
 0x5b8   :  { %776 = vmatpush1.msra.mxu1 %v1292_v32 }
 0x5b9   :  { %951 = vmatprep.subr.mxu1 %v1249_v2 }
 0x669   :  { %v621_v27 = vpop.f32.mrf.mxu1 }
 0x66a   :  { %v626_v31 = vadd.f32 %v621_v27, %v205_v25  ;;  %v225_v27 = vadd.f32 %v1410_v54, %v1340_v40 }
 0x66b   :  { %v623_v33 = vpop.f32.mrf.mxu1 }
 0x66c   :  { %1087 = vtanh.f32 %v626_v31  ;;  %v627_v34 = vadd.f32 %v623_v33, %v207_v29 }
 0x66e   :  { %1089 = vtanh.f32 %v627_v34 }
 0x679   :  { %v1088_v35 = vpop.eup %1087 }
 0x67a   :  { %v630_v36 = vadd.f32 1.0, %v1088_v35 }
 0x67b   :  { %v1090_v38 = vpop.eup %1089 }
 0x67c   :  { %v631_v37 = vmul.f32 0.5, %v630_v36  ;;  %v632_v44 = vadd.f32 1.0, %v1090_v38 }
 0x67e   :  { %v635_v41 = vmul.f32 %v1090_v38, %v631_v37  ;;  %v634_v42 = vmul.f32 %v631_v37, %v545_v13  ;;  %v633_v45 = vmul.f32 0.5, %v632_v44 }
 0x680   :  { %637 = vrot.lane.b32.xlu0 %v635_v41, %s1211_s3 }
 0x6f2   :  { %v638_v43 = vpop.permute.xlu0 %637 }
 0x6f3   :  { %v640_v2 = vadd.f32 %v638_v43, %v634_v42 }
 0x6f5   :  { %1091 = vtanh.f32 %v640_v2 }
 0x702   :  { %v1092_v46 = vpop.eup %1091 }
 0x703   :  { %v642_v47 = vmul.f32 %v1092_v46, %v633_v45  ;;  %v229_v46 = vadd.f32 %v1412_v55, %v1338_v39 }
 0x705   :  { %646 = vrot.lane.b32.xlu1 %v642_v47, %s1211_s3 }
 0x777   :  { %v647_v48 = vpop.permute.xlu1 %646 }
 0x778   :  { %1055 = vmatmul.mubr.msk.f32.vlgmr.msra.gmra.mxu0 %vm95_vm0, %v647_v48  ;;  %v231_v48 = vadd.f32 %v1414_v56, %v1340_v40 }
 0x779   :  { %857 = vmatpush1.msra.mxu0 %v1252_v4  ;;  %904 = vmatprep.mubr.f32.mxu0 %v1210_v0 }
 0x77a   :  { %858 = vmatprep.subr.mxu0 %v1254_v6 }
 0x77b   :  { %859 = vmatpush1.msra.mxu0 %v1257_v8 }
 0x77c   :  { %860 = vmatprep.subr.mxu0 %v1260_v10 }
 0x77d   :  { %861 = vmatpush1.msra.mxu0 %v1262_v12 }
 0x77e   :  { %862 = vmatprep.subr.mxu0 %v1265_v14 }
 0x77f   :  { %863 = vmatpush1.msra.mxu0 %v1268_v16 }
 0x780   :  { %864 = vmatprep.subr.mxu0 %v1271_v18 }
 0x781   :  { %865 = vmatpush1.msra.mxu0 %v1274_v20 }
 0x782   :  { %866 = vmatprep.subr.mxu0 %v1277_v22 }
 0x783   :  { %867 = vmatpush1.msra.mxu0 %v1280_v24 }
 0x784   :  { %868 = vmatprep.subr.mxu0 %v1283_v26 }
 0x785   :  { %869 = vmatpush1.msra.mxu0 %v1286_v28 }
 0x786   :  { %870 = vmatprep.subr.mxu0 %v1289_v30 }
 0x787   :  { %871 = vmatpush1.msra.mxu0 %v1292_v32 }
 0x838   :  { %v716_v58 = vpop.f32.mrf.mxu0 }
 0x839   :  { %v721_v60 = vadd.f32 %v716_v58, %v211_v57 }
 0x83a   :  { %v718_v61 = vpop.f32.mrf.mxu0 }
 0x83b   :  { %1093 = vtanh.f32 %v721_v60  ;;  %v722_v62 = vadd.f32 %v718_v61, %v213_v59 }
 0x83d   :  { %1095 = vtanh.f32 %v722_v62 }
 0x848   :  { %v1094_v63 = vpop.eup %1093 }
 0x849   :  { %v725_v1 = vadd.f32 1.0, %v1094_v63 }
 0x84a   :  { %v1096_v5 = vpop.eup %1095 }
 0x84b   :  { %v726_v3 = vmul.f32 0.5, %v725_v1  ;;  %v727_v49 = vadd.f32 1.0, %v1096_v5 }
 0x84d   :  { %v730_v7 = vmul.f32 %v1096_v5, %v726_v3  ;;  %v729_v9 = vmul.f32 %v726_v3, %v640_v2  ;;  %v728_v15 = vmul.f32 0.5, %v727_v49 }
 0x84f   :  { %732 = vrot.lane.b32.xlu0 %v730_v7, %s1211_s3 }
 0x8c1   :  { %v733_v11 = vpop.permute.xlu0 %732 }
 0x8c2   :  { %v735_v13 = vadd.f32 %v733_v11, %v729_v9 }
 0x8c4   :  { %1097 = vtanh.f32 %v735_v13 }
 0x8d1   :  { %v1098_v17 = vpop.eup %1097 }
 0x8d2   :  { %v737_v50 = vmul.f32 %v1098_v17, %v728_v15 }
 0x8d4   :  { %741 = vrot.lane.b32.xlu1 %v737_v50, %s1211_s3 }
 0x946   :  { %v742_v19 = vpop.permute.xlu1 %741 }
 0x947   :  { %1056 = vmatmul.mubr.msk.f32.vlgmr.msra.gmra.mxu1 %vm95_vm0, %v742_v19 }
 0x948   :  { %952 = vmatpush1.msra.mxu1 %v1252_v4  ;;  %999 = vmatprep.mubr.f32.mxu1 %v1210_v0  ;;  %v217_v0 = vadd.f32 %v1404_v51, %v1338_v39 }
 0x949   :  { %953 = vmatprep.subr.mxu1 %v1254_v6  ;;  %v219_v6 = vadd.f32 %v1406_v52, %v1340_v40 }
 0x94a   :  { %954 = vmatpush1.msra.mxu1 %v1257_v8 }
 0x94b   :  { %955 = vmatprep.subr.mxu1 %v1260_v10 }
 0x94c   :  { %956 = vmatpush1.msra.mxu1 %v1262_v12 }
 0x94d   :  { %957 = vmatprep.subr.mxu1 %v1265_v14 }
 0x94e   :  { %958 = vmatpush1.msra.mxu1 %v1268_v16 }
 0x94f   :  { %959 = vmatprep.subr.mxu1 %v1271_v18 }
 0x950   :  { %960 = vmatpush1.msra.mxu1 %v1274_v20 }
 0x951   :  { %961 = vmatprep.subr.mxu1 %v1277_v22 }
 0x952   :  { %962 = vmatpush1.msra.mxu1 %v1280_v24 }
 0x953   :  { %963 = vmatprep.subr.mxu1 %v1283_v26 }
 0x954   :  { %964 = vmatpush1.msra.mxu1 %v1286_v28 }
 0x955   :  { %965 = vmatprep.subr.mxu1 %v1289_v30 }
 0x956   :  { %966 = vmatpush1.msra.mxu1 %v1292_v32 }
 0xa07   :  { %v811_v4 = vpop.f32.mrf.mxu1 }
 0xa08   :  { %v816_v8 = vadd.f32 %v811_v4, %v217_v0 }
 0xa09   :  { %v813_v10 = vpop.f32.mrf.mxu1 }
 0xa0a   :  { %1099 = vtanh.f32 %v816_v8  ;;  %v817_v12 = vadd.f32 %v813_v10, %v219_v6 }
 0xa0c   :  { %1101 = vtanh.f32 %v817_v12 }
 0xa17   :  { %v1100_v14 = vpop.eup %1099 }
 0xa18   :  { %v820_v16 = vadd.f32 1.0, %v1100_v14 }
 0xa19   :  { %v1102_v20 = vpop.eup %1101 }
 0xa1a   :  { %v821_v18 = vmul.f32 0.5, %v820_v16  ;;  %v822_v30 = vadd.f32 1.0, %v1102_v20 }
 0xa1c   :  { %v825_v22 = vmul.f32 %v1102_v20, %v821_v18  ;;  %v824_v24 = vmul.f32 %v821_v18, %v735_v13  ;;  %v823_v32 = vmul.f32 0.5, %v822_v30 }
 0xa1e   :  { %827 = vrot.lane.b32.xlu0 %v825_v22, %s1211_s3 }
 0xa90   :  { %v828_v26 = vpop.permute.xlu0 %827 }
 0xa91   :  { %v830_v28 = vadd.f32 %v828_v26, %v824_v24 }
 0xa93   :  { %1103 = vtanh.f32 %v830_v28 }
 0xaa0   :  { %v1104_v51 = vpop.eup %1103 }
 0xaa1   :  { %v832_v52 = vmul.f32 %v1104_v51, %v823_v32 }
 0xaa3   :  { %836 = vrot.lane.b32.xlu1 %v832_v52, %s1211_s3 }
 0xb15   :  { %v837_v21 = vpop.permute.xlu1 %836 }
 0xb16   :  { %1057 = vmatmul.mubr.msk.f32.vlgmr.msra.gmra.mxu0 %vm95_vm0, %v837_v21 }
 0xbd6   :  { %v906_v25 = vpop.f32.mrf.mxu0 }
 0xbd7   :  { %v911_v29 = vadd.f32 %v906_v25, %v223_v23 }
 0xbd8   :  { %v908_v31 = vpop.f32.mrf.mxu0 }
 0xbd9   :  { %1105 = vtanh.f32 %v911_v29  ;;  %v912_v33 = vadd.f32 %v908_v31, %v225_v27 }
 0xbdb   :  { %1107 = vtanh.f32 %v912_v33 }
 0xbe6   :  { %v1106_v34 = vpop.eup %1105 }
 0xbe7   :  { %v915_v35 = vadd.f32 1.0, %v1106_v34 }
 0xbe8   :  { %v1108_v37 = vpop.eup %1107 }
 0xbe9   :  { %v916_v36 = vmul.f32 0.5, %v915_v35  ;;  %v917_v53 = vadd.f32 1.0, %v1108_v37 }
 0xbeb   :  { %v920_v38 = vmul.f32 %v1108_v37, %v916_v36  ;;  %v919_v41 = vmul.f32 %v916_v36, %v830_v28  ;;  %v918_v2 = vmul.f32 0.5, %v917_v53 }
 0xbed   :  { %922 = vrot.lane.b32.xlu0 %v920_v38, %s1211_s3 }
 0xc5f   :  { %v923_v42 = vpop.permute.xlu0 %922 }
 0xc60   :  { %v925_v43 = vadd.f32 %v923_v42, %v919_v41 }
 0xc62   :  { %1109 = vtanh.f32 %v925_v43 }
 0xc6f   :  { %v1110_v44 = vpop.eup %1109 }
 0xc70   :  { %v927_v54 = vmul.f32 %v1110_v44, %v918_v2 }
 0xc72   :  { %931 = vrot.lane.b32.xlu1 %v927_v54, %s1211_s3 }
 0xce4   :  { %v932_v45 = vpop.permute.xlu1 %931 }
 0xce5   :  { %1058 = vmatmul.mubr.msk.f32.vlgmr.msra.gmra.mxu1 %vm95_vm0, %v932_v45 }
 0xda5   :  { %v1001_v47 = vpop.f32.mrf.mxu1 }
 0xda6   :  { %v1006_v57 = vadd.f32 %v1001_v47, %v229_v46 }
 0xda7   :  { %v1003_v58 = vpop.f32.mrf.mxu1 }
 0xda8   :  { %1111 = vtanh.f32 %v1006_v57  ;;  %v1007_v59 = vadd.f32 %v1003_v58, %v231_v48 }
 0xdaa   :  { %1113 = vtanh.f32 %v1007_v59 }
 0xdb5   :  { %v1112_v60 = vpop.eup %1111 }
 0xdb6   :  { %v1010_v61 = vadd.f32 1.0, %v1112_v60 }
 0xdb7   :  { %v1114_v63 = vpop.eup %1113 }
 0xdb8   :  { %v1011_v62 = vmul.f32 0.5, %v1010_v61  ;;  %v1012_v39 = vadd.f32 1.0, %v1114_v63 }
 0xdba   :  { %v1015_v1 = vmul.f32 %v1114_v63, %v1011_v62  ;;  %v1014_v3 = vmul.f32 %v1011_v62, %v925_v43  ;;  %v1013_v55 = vmul.f32 0.5, %v1012_v39 }
 0xdbc   :  { %1017 = vrot.lane.b32.xlu0 %v1015_v1, %s1211_s3 }
 0xe2e   :  { %v1018_v5 = vpop.permute.xlu0 %1017 }
 0xe2f   :  { %v1020_v7 = vadd.f32 %v1018_v5, %v1014_v3 }
 0xe31   :  { %1115 = vtanh.f32 %v1020_v7 }
 0xe3e   :  { %v1116_v9 = vpop.eup %1115 }
 0xe3f   :  { %v1022_v40 = vmul.f32 %v1116_v9, %v1013_v55 }
 0xe41   :  { %1024 = vrot.lane.b32.xlu1 %v1022_v40, %s1211_s3 }
 0xeb3   :  { %v1025_v56 = vpop.permute.xlu1 %1024 }
 0xeb4   :  { %1027 = vst.msk [vmem:[#allocation9] sm:$0xff] %vm95_vm0, %v1025_v56 }
 0xeb5   :  { %1188 = shalt.err (!%p1185_p5)
}
 0xeb6   :  { %1037 = dma.vmem_to_hbm [thread:$0]  %s1035_s8, 128, %s1510_s4, [#allocation5]  }
 0xeb7   :  { %1201 = dma.done.wait [#allocation5], 128  }
 0xeb8   :  { %1202 = vsyncadd [#allocation5], 4294967168 }
 0xeb9   :  { %1041 = vsyncpa [#allocation4], 1 }
 0xeba   :  { %1042 = vsyncpa [#allocation7], 1 }
 0xebb   :  { %1043 = vsyncpa [#allocation5], 1 }

</bundles_post_ra>
